<compile_context>
chip_gen: v6e
topology: v6e:2x2x1
jax: 0.10.0
libtpu: 0.0.40
codegen_flags: <defaults>
</compile_context>

<pallas_src>
import jax
import jax.numpy as jnp
from jax.experimental import pallas as pl
from jax.experimental.pallas import tpu as pltpu


def cls_pre_kernel(x_ref, w1_ref, w2_ref, aux_ref, b3_ref, o_ref):
    # x_ref block: (1, C, TN) for the current (batch, N-tile); f32 or bf16.
    x = x_ref[0].astype(jnp.bfloat16)                  # (C, TN) bf16 for MXU

    b1 = aux_ref[0]                                    # (C, 1) f32 folded bias 1
    b2 = aux_ref[1]                                    # (C, 1) f32 folded bias 2
    w3 = aux_ref[2]                                    # (C, 1) f32 conv3 weight

    # layer 1: conv1 + bn1 folded into (w1, b1), then ReLU
    h = jnp.dot(w1_ref[...], x, preferred_element_type=jnp.float32)  # (C, TN)
    h = jnp.maximum(h + b1, 0.0)

    # layer 2: conv2 + bn2 folded into (w2, b2), then ReLU
    h = jnp.dot(w2_ref[...], h.astype(jnp.bfloat16),
                preferred_element_type=jnp.float32)
    h = jnp.maximum(h + b2, 0.0)

    # layer 3: conv3 (C -> 1) as broadcast-mul + sublane reduce (VPU + XLU);
    # result is a lane-dense (1, TN) row.
    y = jnp.sum(w3 * h, axis=0, keepdims=True) + b3_ref[0]
    o_ref[0] = y


def _pick_n_tile(n_pad, batch, max_tile=2048):
    """Pick TN: a multiple of 128 dividing n_pad, as large as possible but
    <= max_tile, preferring >= 2 total grid steps (keeps both v7x TCs busy)."""
    n_blocks = n_pad // 128
    tiles = [128 * d for d in range(1, n_blocks + 1) if n_blocks % d == 0]
    # Prefer the largest tile that still yields at least 2 grid steps.
    pref = [t for t in tiles if t <= max_tile and batch * (n_pad // t) >= 2]
    if pref:
        return max(pref)
    fits = [t for t in tiles if t <= max_tile]   # 128 always qualifies
    return max(fits) if fits else 128


def cls_pre_forward(seed_features, params, *, max_n_tile=2048):
    """seed_features: (B, C, N) float32 or bfloat16 -> squeeze((B, N, 1))."""
    B, C, N = seed_features.shape
    w1, w2, aux, b3 = params

    # Pad N up to a multiple of 128: keeps loads/stores lane-dense, keeps the
    # x block bounded (no full-N fallback -> no v7x VMEM blowup).
    n_pad = ((N + 127) // 128) * 128
    x = seed_features
    if n_pad != N:
        x = jnp.pad(x, ((0, 0), (0, 0), (0, n_pad - N)))

    TN = _pick_n_tile(n_pad, B, max_n_tile)
    grid = (B, n_pad // TN)

    out = pl.pallas_call(
        cls_pre_kernel,
        out_shape=jax.ShapeDtypeStruct((B, 1, n_pad), jnp.float32),
        grid_spec=pltpu.PrefetchScalarGridSpec(
            num_scalar_prefetch=0,
            grid=grid,
            in_specs=[
                pl.BlockSpec((1, C, TN), lambda b, t: (b, 0, t)),   # x slab
                pl.BlockSpec((C, C), lambda b, t: (0, 0)),          # w1 (folded, bf16)
                pl.BlockSpec((C, C), lambda b, t: (0, 0)),          # w2 (folded, bf16)
                pl.BlockSpec((3, C, 1), lambda b, t: (0, 0, 0)),    # b1/b2/w3 packed (f32)
                pl.BlockSpec(memory_space=pltpu.MemorySpace.SMEM),  # b3 scalar
            ],
            out_specs=pl.BlockSpec((1, 1, TN), lambda b, t: (b, 0, t)),
        ),
        compiler_params=pltpu.CompilerParams(
            dimension_semantics=("parallel", "parallel"),
            vmem_limit_bytes=32 * 1024 * 1024),
    )(x, w1, w2, aux, b3)

    out = out[:, 0, :N]                       # drop pad -> (B, N)
    # torch: net.transpose(2,1) -> (B, N, 1); torch.squeeze removes ALL
    # size-1 dims (so B==1 gives (N,)).  Mirror that exactly.
    return jnp.squeeze(out.reshape(B, N, 1))


def init_raw_params(key, C):
    """Raw parameters mirroring nn.Conv1d / nn.BatchNorm1d initialization."""
    ks = jax.random.split(key, 6)
    bound = 1.0 / jnp.sqrt(jnp.asarray(C, jnp.float32))   # fan_in = C * 1
    return dict(
        w1=jax.random.uniform(ks[0], (C, C), jnp.float32, -bound, bound),
        b1=jax.random.uniform(ks[1], (C,), jnp.float32, -bound, bound),
        w2=jax.random.uniform(ks[2], (C, C), jnp.float32, -bound, bound),
        b2=jax.random.uniform(ks[3], (C,), jnp.float32, -bound, bound),
        w3=jax.random.uniform(ks[4], (1, C), jnp.float32, -bound, bound),
        b3=jax.random.uniform(ks[5], (1,), jnp.float32, -bound, bound),
        # BatchNorm1d eval-mode stats / affine (freshly initialized)
        gamma1=jnp.ones((C,), jnp.float32), beta1=jnp.zeros((C,), jnp.float32),
        mean1=jnp.zeros((C,), jnp.float32), var1=jnp.ones((C,), jnp.float32),
        gamma2=jnp.ones((C,), jnp.float32), beta2=jnp.zeros((C,), jnp.float32),
        mean2=jnp.zeros((C,), jnp.float32), var2=jnp.ones((C,), jnp.float32),
        eps=1e-5,
    )


def fold_params(raw):
    """Fold conv bias + eval-mode BN into per-layer (weight, bias); cast MXU
    operands to bf16; pack the small per-channel vectors into one operand."""
    C = raw["w1"].shape[0]
    eps = raw["eps"]

    def fold(w, b, gamma, beta, mean, var):
        s = gamma / jnp.sqrt(var + eps)               # (C,)
        t = beta - mean * s
        wf = (s[:, None] * w).astype(jnp.bfloat16)    # (Cout, Cin) bf16
        bf = (b * s + t).reshape(C, 1)                # (C, 1) f32
        return wf, bf

    w1f, b1f = fold(raw["w1"], raw["b1"], raw["gamma1"], raw["beta1"],
                    raw["mean1"], raw["var1"])
    w2f, b2f = fold(raw["w2"], raw["b2"], raw["gamma2"], raw["beta2"],
                    raw["mean2"], raw["var2"])
    w3f = raw["w3"].reshape(C, 1)                     # (C, 1) f32 (VPU path)
    aux = jnp.stack([b1f, b2f, w3f], axis=0)          # (3, C, 1) f32 packed
    b3f = raw["b3"]                                   # (1,) f32, lives in SMEM
    return (w1f, w2f, aux, b3f)


def cls_pre_reference(seed_features, raw):
    """Plain-JAX f32 reference with PyTorch eval-mode semantics."""
    eps = raw["eps"]

    def bn(h, gamma, beta, mean, var):
        s = gamma / jnp.sqrt(var + eps)
        t = beta - mean * s
        return h * s[None, :, None] + t[None, :, None]

    x = seed_features                                            # (B, C, N)
    h = jnp.einsum("oc,bcn->bon", raw["w1"], x) + raw["b1"][None, :, None]
    h = jnp.maximum(bn(h, raw["gamma1"], raw["beta1"], raw["mean1"], raw["var1"]), 0.0)
    h = jnp.einsum("oc,bcn->bon", raw["w2"], h) + raw["b2"][None, :, None]
    h = jnp.maximum(bn(h, raw["gamma2"], raw["beta2"], raw["mean2"], raw["var2"]), 0.0)
    y = jnp.einsum("oc,bcn->bon", raw["w3"], h) + raw["b3"][None, :, None]   # (B,1,N)
    B, _, N = y.shape
    return jnp.squeeze(jnp.transpose(y, (0, 2, 1)))              # torch.squeeze semantics


if __name__ == "__main__":
    # Module config: vote_factor is unused in forward; seed_feature_dim = C.
    key = jax.random.PRNGKey(0)
    k_x, k_p, k_x2 = jax.random.split(key, 3)

    C = 64
    raw = init_raw_params(k_p, C)
    params = fold_params(raw)

    # --- Case 1: B=2, N multiple of 128, f32 input -------------------------
    B, N = 2, 256
    seed_features = jax.random.normal(k_x, (B, C, N), jnp.float32)
    out = jax.block_until_ready(cls_pre_forward(seed_features, params))
    ref = cls_pre_reference(seed_features, raw)
    assert out.shape == (B, N), out.shape
    err = float(jnp.max(jnp.abs(out - ref)))
    assert jnp.allclose(out, ref, atol=3e-2, rtol=3e-2), f"case1 mismatch: {err}"

    # --- Case 2: B=1, N not a multiple of 128 (exercises padding + >=2-step
    # grid preference + torch.squeeze of the batch dim) ----------------------
    B2, N2 = 1, 300
    seed_features2 = jax.random.normal(k_x2, (B2, C, N2), jnp.float32)
    out2 = jax.block_until_ready(cls_pre_forward(seed_features2, params))
    ref2 = cls_pre_reference(seed_features2, raw)
    assert out2.shape == (N2,), out2.shape          # torch.squeeze drops B==1
    err2 = float(jnp.max(jnp.abs(out2 - ref2)))
    assert jnp.allclose(out2, ref2, atol=3e-2, rtol=3e-2), f"case2 mismatch: {err2}"

    # --- Case 3: bf16 seed_features (halves the dominant HBM stream; the
    # in-kernel cast becomes a no-op). Reference uses the same rounded input.
    x_bf16 = seed_features.astype(jnp.bfloat16)
    out3 = jax.block_until_ready(cls_pre_forward(x_bf16, params))
    ref3 = cls_pre_reference(x_bf16.astype(jnp.float32), raw)
    err3 = float(jnp.max(jnp.abs(out3 - ref3)))
    assert jnp.allclose(out3, ref3, atol=3e-2, rtol=3e-2), f"case3 mismatch: {err3}"

    print("KERNEL_OK")
</pallas_src>

<mosaic_0001>
module attributes {stable_mosaic.version = 11 : i64} {
  func.func @cls_pre_kernel(%arg0: i32, %arg1: i32, %arg2: memref<1x64x256xf32, #tpu.memory_space<vmem>>, %arg3: memref<64x64xbf16, #tpu.memory_space<vmem>>, %arg4: memref<64x64xbf16, #tpu.memory_space<vmem>>, %arg5: memref<3x64x1xf32, #tpu.memory_space<vmem>>, %arg6: memref<1xf32, #tpu.memory_space<smem>>, %arg7: memref<1x1x256xf32, #tpu.memory_space<vmem>>) attributes {dimension_semantics = [#tpu.dimension_semantics<parallel>, #tpu.dimension_semantics<parallel>], iteration_bounds = array<i64: 2, 1>, scalar_prefetch = 0 : i64, scratch_operands = 0 : i64, tpu.core_type = #tpu.core_type<tc>, window_params = [{transform_indices = @transform_0, window_bounds = array<i64: 1, 64, 256>}, {pipeline_mode = #tpu.pipeline_mode<synchronous>, transform_indices = @transform_1, window_bounds = array<i64: 64, 64>}, {pipeline_mode = #tpu.pipeline_mode<synchronous>, transform_indices = @transform_2, window_bounds = array<i64: 64, 64>}, {pipeline_mode = #tpu.pipeline_mode<synchronous>, transform_indices = @transform_3, window_bounds = array<i64: 3, 64, 1>}, {transform_indices = @transform_4, window_bounds = array<i64: 1>}, {transform_indices = @transform_5, window_bounds = array<i64: 1, 1, 256>}]} {
    %c0 = arith.constant 0 : index
    %c0_0 = arith.constant 0 : index
    %c0_1 = arith.constant 0 : index
    %0 = vector.load %arg2[%c0, %c0_0, %c0_1] : memref<1x64x256xf32, #tpu.memory_space<vmem>>, vector<1x64x256xf32>
    %1 = vector.shape_cast %0 : vector<1x64x256xf32> to vector<64x256xf32>
    %2 = arith.truncf %1 : vector<64x256xf32> to vector<64x256xbf16>
    %c0_2 = arith.constant 0 : index
    %c0_3 = arith.constant 0 : index
    %c0_4 = arith.constant 0 : index
    %3 = vector.load %arg5[%c0_2, %c0_3, %c0_4] : memref<3x64x1xf32, #tpu.memory_space<vmem>>, vector<1x64x1xf32>
    %4 = vector.shape_cast %3 : vector<1x64x1xf32> to vector<64x1xf32>
    %c1 = arith.constant 1 : index
    %c0_5 = arith.constant 0 : index
    %c0_6 = arith.constant 0 : index
    %5 = vector.load %arg5[%c1, %c0_5, %c0_6] : memref<3x64x1xf32, #tpu.memory_space<vmem>>, vector<1x64x1xf32>
    %6 = vector.shape_cast %5 : vector<1x64x1xf32> to vector<64x1xf32>
    %c2 = arith.constant 2 : index
    %c0_7 = arith.constant 0 : index
    %c0_8 = arith.constant 0 : index
    %7 = vector.load %arg5[%c2, %c0_7, %c0_8] : memref<3x64x1xf32, #tpu.memory_space<vmem>>, vector<1x64x1xf32>
    %8 = vector.shape_cast %7 : vector<1x64x1xf32> to vector<64x1xf32>
    %c0_9 = arith.constant 0 : index
    %c0_10 = arith.constant 0 : index
    %9 = vector.load %arg3[%c0_9, %c0_10] : memref<64x64xbf16, #tpu.memory_space<vmem>>, vector<64x64xbf16>
    %cst = arith.constant dense<0.000000e+00> : vector<64x256xf32>
    %10 = tpu.matmul %9, %2, %cst {dimension_numbers = #tpu.dot_dimension_numbers<[1], [0], [0], [1], [0, 0, 1, 1], [], []>} : vector<64x64xbf16>, vector<64x256xbf16>, vector<64x256xf32> -> vector<64x256xf32>
    %11 = vector.broadcast %4 : vector<64x1xf32> to vector<64x256xf32>
    %12 = arith.addf %10, %11 : vector<64x256xf32>
    %cst_11 = arith.constant 0.000000e+00 : f32
    %13 = vector.broadcast %cst_11 : f32 to vector<64x256xf32>
    %14 = arith.maximumf %12, %13 : vector<64x256xf32>
    %c0_12 = arith.constant 0 : index
    %c0_13 = arith.constant 0 : index
    %15 = vector.load %arg4[%c0_12, %c0_13] : memref<64x64xbf16, #tpu.memory_space<vmem>>, vector<64x64xbf16>
    %16 = arith.truncf %14 : vector<64x256xf32> to vector<64x256xbf16>
    %cst_14 = arith.constant dense<0.000000e+00> : vector<64x256xf32>
    %17 = tpu.matmul %15, %16, %cst_14 {dimension_numbers = #tpu.dot_dimension_numbers<[1], [0], [0], [1], [0, 0, 1, 1], [], []>} : vector<64x64xbf16>, vector<64x256xbf16>, vector<64x256xf32> -> vector<64x256xf32>
    %18 = vector.broadcast %6 : vector<64x1xf32> to vector<64x256xf32>
    %19 = arith.addf %17, %18 : vector<64x256xf32>
    %cst_15 = arith.constant 0.000000e+00 : f32
    %20 = vector.broadcast %cst_15 : f32 to vector<64x256xf32>
    %21 = arith.maximumf %19, %20 : vector<64x256xf32>
    %22 = vector.broadcast %8 : vector<64x1xf32> to vector<64x256xf32>
    %23 = arith.mulf %22, %21 : vector<64x256xf32>
    %cst_16 = arith.constant dense<0.000000e+00> : vector<256xf32>
    %24 = vector.multi_reduction <add>, %23, %cst_16 [0] : vector<64x256xf32> to vector<256xf32>
    %25 = vector.shape_cast %24 : vector<256xf32> to vector<1x256xf32>
    %c0_17 = arith.constant 0 : index
    %26 = memref.load %arg6[%c0_17] : memref<1xf32, #tpu.memory_space<smem>>
    %27 = vector.broadcast %26 : f32 to vector<1x256xf32>
    %28 = arith.addf %25, %27 : vector<1x256xf32>
    %c0_18 = arith.constant 0 : index
    %c0_19 = arith.constant 0 : index
    %c0_20 = arith.constant 0 : index
    %29 = vector.load %arg7[%c0_18, %c0_19, %c0_20] : memref<1x1x256xf32, #tpu.memory_space<vmem>>, vector<1x1x256xf32>
    %30 = vector.shape_cast %29 : vector<1x1x256xf32> to vector<1x256xf32>
    %31 = vector.shape_cast %28 : vector<1x256xf32> to vector<1x1x256xf32>
    tpu.vector_store %arg7[%c0_18, %c0_19, %c0_20], %31 {strides = array<i32>} : memref<1x1x256xf32, #tpu.memory_space<vmem>>, vector<1x1x256xf32>,
    return
  }
  func.func @transform_0(%arg0: i32, %arg1: i32) -> (i32, i32, i32) {
    %c0_i32 = arith.constant 0 : i32
    %c0_i32_0 = arith.constant 0 : i32
    return %arg0, %c0_i32, %arg1 : i32, i32, i32
  }
  func.func @transform_1(%arg0: i32, %arg1: i32) -> (i32, i32) {
    %c0_i32 = arith.constant 0 : i32
    %c0_i32_0 = arith.constant 0 : i32
    %c0_i32_1 = arith.constant 0 : i32
    return %c0_i32, %c0_i32_0 : i32, i32
  }
  func.func @transform_2(%arg0: i32, %arg1: i32) -> (i32, i32) {
    %c0_i32 = arith.constant 0 : i32
    %c0_i32_0 = arith.constant 0 : i32
    %c0_i32_1 = arith.constant 0 : i32
    return %c0_i32, %c0_i32_0 : i32, i32
  }
  func.func @transform_3(%arg0: i32, %arg1: i32) -> (i32, i32, i32) {
    %c0_i32 = arith.constant 0 : i32
    %c0_i32_0 = arith.constant 0 : i32
    %c0_i32_1 = arith.constant 0 : i32
    %c0_i32_2 = arith.constant 0 : i32
    return %c0_i32, %c0_i32_0, %c0_i32_1 : i32, i32, i32
  }
  func.func @transform_4(%arg0: i32, %arg1: i32) -> i32 {
    %c0_i32 = arith.constant 0 : i32
    %c0_i32_0 = arith.constant 0 : i32
    return %c0_i32 : i32
  }
  func.func @transform_5(%arg0: i32, %arg1: i32) -> (i32, i32, i32) {
    %c0_i32 = arith.constant 0 : i32
    %c0_i32_0 = arith.constant 0 : i32
    return %arg0, %c0_i32, %arg1 : i32, i32, i32
  }
}

</mosaic_0001>

<bundles_post_ra>
// kernel: tpu_custom_call.1
= control target key start
LH: loop header
LB: loop body
LE: loop exit
PB: predicated region body
PF: predicated region fallthrough
CT: control target
= control target key end

     0   :  { %s1411_s0 = inlined_call_operand.hbm [shape: f32[2,64,256], index: 0, kind: input, shape index: {}]   ;;  %s1412_s1 = inlined_call_operand.vmem [shape: bf16[64,64], index: 1, kind: input, shape index: {}]   ;;  %s1413_s2 = inlined_call_operand.vmem [shape: bf16[64,64], index: 2, kind: input, shape index: {}]   ;;  %s1414_s3 = inlined_call_operand.vmem [shape: f32[3,64,1], index: 3, kind: input, shape index: {}]   ;;  %s1415_s4 = inlined_call_operand.<no memory space> [shape: f32[1], index: 4, kind: input, shape index: {}]   ;;  %s1416_s5 = inlined_call_operand.hbm [shape: f32[2,1,256], index: 5, kind: output, shape index: {}]  }
   0x1   :  { %10 = sst [smem:[#allocation2]] %s1415_s4 }
   0x2   :  { %11 = vsyncpa [#allocation4], 0 }
   0x3   :  { %13 = vsyncpa [#allocation4 + $0x1], 0 }
   0x4   :  { %14 = vsyncpa [#allocation5], 0 }
   0x5   :  { %16 = vsyncpa [#allocation5 + $0x1], 0  ;;  %s1146_s20 = smov 0   ;;  %s1148_s21 = smov 0  }
   0x6   :  { %s1150_s22 = smov 0   ;;  %s1152_s23 = smov 0  }
   0x7   :  { %s1154_s24 = smov 0   ;;  %s1156_s25 = smov 0  }
   0x8 LB: > { %s872_s4 = sadd.s32 4294967295, %s1105_s25   ;;  %s873_s26 = sadd.s32 4294967294, %s1105_s25   ;;  %s1105_s25 = sphi %s1156_s25, %s22_s25   ;;  %s1101_s24 = sphi %s1154_s24, %s1427_s24   ;;  %s1097_s23 = sphi %s1152_s23, %s1426_s23   ;;  %s1093_s22 = sphi %s1150_s22, %s1425_s22   ;;  %s1089_s21 = sphi %s1148_s21, %s1424_s21   ;;  %s1085_s20 = sphi %s1146_s20, %s1423_s20  }
   0x9   : > { %s34_s27 = sadd.s32 1, %s1101_s24  ;;  %s43_s28 = sadd.s32 1, %s1093_s22 }
   0xa   : > { %p36_p0 = scmp.ge.s32.totalorder %s34_s27, 2  ;;  %p50_p1 = scmp.ne.s32.totalorder %s1093_s22, %s1089_s21 }
   0xb   : > { %p51_p2 = scmp.eq.s32.totalorder %s1105_s25, 0  ;;  %p56_p3 = scmp.ne.s32.totalorder %s1089_s21, %s1085_s20 }
   0xc   : > { %s1429_s27 = smov (%p36_p0, %s34_s27), 0  ;;  %p57_p5 = scmp.eq.s32.totalorder %s872_s4, 0 }
   0xd   : > { %p1187_p4 = por %p51_p2, %p50_p1  ;;  %s38_s30 = ssub.s32 %s1101_s24, %s1429_s27 }
   0xe   : > { %p166_p6 = scmp.eq.s32.totalorder %s872_s4, 1  ;;  %p41_p7 = scmp.eq.s32.totalorder %s38_s30, 0 }
   0xf   : > { %p1193_p8 = por %p57_p5, %p56_p3  ;;  %p172_p10 = scmp.eq.s32.totalorder %s873_s26, 1 }
  0x10   : > { %p1197_p9 = por %p166_p6, %p50_p1  ;;  %p933_p13 = scmp.lt.s32.totalorder %s1105_s25, 2 }
  0x11   : > { %s1202_s8 = scalar_select %p41_p7, %s1093_s22, %s43_s28  }
  0x12   : > { %p1204_p11 = por %p172_p10, %p56_p3  ;;  %s204_s10 = sand.u32 1, %s1093_s22  }
  0x13   : > { %s876_s11 = sshll.u32 %s204_s10, 7  ;;  %s919_s12 = sshll.u32 %s1101_s24, 11 }
  0x14   : > { %s216_s15 = scalar_lea.hbm %s1411_s0, %s919_s12  ;;  %s208_s16 = scalar_lea.vmem [#allocation3], %s876_s11 }
  0x15   : > { %s217_s17 = sshll.u32 %s208_s16, 4  ;;  %p1217_p0 = pnand %p933_p13, %p1187_p4  ;;  %s218_s17 = int_to_ptr.vmem [resolvable:$true] %s217_s17 }
  0x16   : > { %p879_p1 = scmp.ge.s32.totalorder %s1105_s25, 1  ;;  %s205_s19 = scalar_lea.sflag [#allocation4], %s204_s10 }
  0x17   : > { %p999_p2 = pneg %p1217_p0  ;;  %s1010_s4 = scalar_lea.vmem %s218_s17, 2048 }
  0x18   : > { %p1011_p3 = scmp.ne.s32.totalorder %s218_s17, %s1010_s4  ;;  %s1107_s26 = smov [#allocation3]  }
  0x19   : > { %s1015_s28 = sshll.u32 %s1107_s26, 4  ;;  %s1016_s28 = int_to_ptr.vmem [resolvable:$false] %s1015_s28 }
  0x1a   : > { %p1013_p5 = pnand %p1011_p3, %p999_p2  ;;  %s1017_s30 = scalar_lea.vmem %s1016_s28, 4096 }
  0x1b   : > { %p1018_p7 = scmp.lt.s32.totalorder %s218_s17, %s1016_s28  ;;  %p1019_p10 = scmp.lt.s32.totalorder %s1017_s30, %s1010_s4 }
  0x1c   : > { %p1014_p6 = pneg %p1013_p5 }
  0x1d   : > { %p1020_p12 = por %p1019_p10, %p1018_p7 }
  0x1f   : > { %p1021_p4 = pnand %p1020_p12, %p1014_p6 }
  0x21   : > { %1024 = shalt.err (!%p1021_p4)
}
  0x22   : > { %s1108_s29 = smov 256   ;;  %s1109_s10 = smov 16  }
  0x23   : > { %928 = dma.hbm_to_vmem [thread:$0]  (!%p1217_p0), %s216_s15, 2048, %s218_s17, %s205_s19, %s1108_s29, %s1108_s29, %s1109_s10  }
  0x24   : > { %p225_p13 = scmp.lt.s32.totalorder %s1105_s25, 3 }
  0x26   : > { %p226_p2 = pnand %p879_p1, %p225_p13 }
  0x27   : > { %s1230_s11 = sand.u32 (!%p226_p2), 1, %s1089_s21  }
  0x28   : > { %229 = sbr.rel (%p226_p2) target bundleno = 574 (0x23e), region = 40  ;;  %s880_s12 = sshll.u32 (!%p226_p2), %s1230_s11, 7 }
  0x29   : > { %s232_s13 = scalar_lea.sflag (!%p226_p2), [#allocation4], %s1230_s11  ;;  %s1234_s14 = scalar_lea.vmem (!%p226_p2), [#allocation3], %s880_s12 }
  0x2d   : > { %1076 = dma.done.wait (%p1193_p8), %s232_s13, 2048  }
  0x2e   : > { %1078 = vsyncadd (%p1193_p8), %s232_s13, 4294965248  ;;  %v1110_v0 = vmov 0   ;;  %v278_v1 = vld [vmem:[%s1234_s14 + $0x68] sm:$0xff]  ;;  %v280_v2 = vld [vmem:[%s1234_s14 + $0x78] sm:$0xff]  ;;  %vm383_vm0 = vcmask 523264   ;;  %s744_s18 = sld [smem:[#allocation2]] }
  0x2f   : > { %428 = vmatprep.mubr.bf16.mxu0 %v1110_v0  ;;  %987 = vset.pattern.permute.xlu0 %v1110_v0  ;;  %v277_v3 = vld [vmem:[%s1234_s14 + $0x60] sm:$0xff]  ;;  %v288_v4 = vpack.c.bf16 %v280_v2, %v278_v1  ;;  %v279_v5 = vld [vmem:[%s1234_s14 + $0x70] sm:$0xff]  ;;  %v274_v6 = vld [vmem:[%s1234_s14 + $0x48] sm:$0xff]  ;;  %s881_s19 = sshll.u32 %s1230_s11, 1  ;;  %s920_s4 = sshll.u32 %s1097_s23, 5 }
  0x30   : > { %988 = vset.pattern.permute.xlu1 %v1110_v0  ;;  %605 = vmatprep.mubr.bf16.mxu1 %v1110_v0  ;;  %v276_v7 = vld [vmem:[%s1234_s14 + $0x58] sm:$0xff]  ;;  %v287_v8 = vpack.c.bf16 %v279_v5, %v277_v3  ;;  %v273_v10 = vld [vmem:[%s1234_s14 + $0x40] sm:$0xff]  ;;  %v275_v11 = vld [vmem:[%s1234_s14 + $0x50] sm:$0xff]  ;;  %s261_s26 = scalar_lea.vmem [#allocation6], %s881_s19  ;;  %s786_s10 = scalar_lea.hbm %s1416_s5, %s920_s4 }
  0x31   : > { %v286_v9 = vpack.c.bf16 %v276_v7, %v274_v6  ;;  %v270_v12 = vld [vmem:[%s1234_s14 + $0x28] sm:$0xff]  ;;  %404 = vmatprep.subr.bf16.mxu0 %v288_v4  ;;  %v272_v13 = vld [vmem:[%s1234_s14 + $0x38] sm:$0xff]  ;;  %v285_v14 = vpack.c.bf16 %v275_v11, %v273_v10  ;;  %v269_v15 = vld [vmem:[%s1234_s14 + $0x20] sm:$0xff]  ;;  %s788_s28 = sshll.u32 %s261_s26, 4  ;;  %s772_s12 = scalar_lea.sflag [#allocation5], %s1230_s11  ;;  %s789_s28 = int_to_ptr.vmem [resolvable:$true] %s788_s28 }
  0x32   : > { %405 = vmatpush1.bf16.msra.mxu0 %v287_v8  ;;  %v271_v16 = vld [vmem:[%s1234_s14 + $0x30] sm:$0xff]  ;;  %v284_v17 = vpack.c.bf16 %v272_v13, %v270_v12  ;;  %v266_v18 = vld [vmem:[%s1234_s14 + $0x8] sm:$0xff]  ;;  %v268_v19 = vld [vmem:[%s1234_s14 + $0x18] sm:$0xff]  ;;  %s1025_s13 = scalar_lea.vmem %s789_s28, 32 }
  0x33   : > { %406 = vmatprep.subr.bf16.mxu0 %v286_v9  ;;  %v283_v20 = vpack.c.bf16 %v271_v16, %v269_v15  ;;  %v282_v21 = vpack.c.bf16 %v268_v19, %v266_v18  ;;  %v265_v22 = vld [vmem:[%s1234_s14] sm:$0xff]  ;;  %v267_v23 = vld [vmem:[%s1234_s14 + $0x10] sm:$0xff]  ;;  %v296_v26 = vld [vmem:[%s1414_s3 + $0x38] sm:$0xff]  ;;  %p1026_p8 = scmp.ne.s32.totalorder %s789_s28, %s1025_s13  ;;  %s1112_s14 = smov [#allocation6]  }
  0x34   : > { %v295_v24 = vld [vmem:[%s1414_s3 + $0x30] sm:$0xff]  ;;  %v293_v25 = vld [vmem:[%s1414_s3 + $0x20] sm:$0xff]  ;;  %v281_v27 = vpack.c.bf16 %v267_v23, %v265_v22  ;;  %v294_v28 = vld [vmem:[%s1414_s3 + $0x28] sm:$0xff]  ;;  %s1029_s6 = sshll.u32 %s1112_s14, 4  ;;  %s1030_s6 = int_to_ptr.vmem [resolvable:$false] %s1029_s6 }
  0x35   : > { %355 = vperm.xlu0 %987, %v295_v24   ;;  %345 = vperm.xlu1 %988, %v293_v25   ;;  %v989_v29 = vld [vmem:[%s1412_s1] sm:$0xff]   ;;  %v291_v30 = vld [vmem:[%s1414_s3 + $0x10] sm:$0xff]  ;;  %v292_v31 = vld [vmem:[%s1414_s3 + $0x18] sm:$0xff]  ;;  %p1027_p12 = pnand %p1026_p8, %p1197_p9  ;;  %s1031_s23 = scalar_lea.vmem %s1030_s6, 64 }
  0x36   : > { %407 = vmatpush1.bf16.msra.mxu0 %v285_v14  ;;  %v289_v32 = vld [vmem:[%s1414_s3] sm:$0xff]  ;;  %v290_v33 = vld [vmem:[%s1414_s3 + $0x8] sm:$0xff]  ;;  %v884_v37 = vld [vmem:[%s1414_s3 + $0x50] sm:$0xff]  ;;  %p1032_p1 = scmp.lt.s32.totalorder %s789_s28, %s1030_s6  ;;  %p1033_p3 = scmp.lt.s32.totalorder %s1031_s23, %s1025_s13 }
  0x37   : > { %408 = vmatprep.subr.bf16.mxu0 %v284_v17  ;;  %v990_v34 = vld [vmem:[%s1412_s1 + $0x8] sm:$0xff]   ;;  %v882_v35 = vld [vmem:[%s1414_s3 + $0x40] sm:$0xff]  ;;  %v885_v38 = vld [vmem:[%s1414_s3 + $0x58] sm:$0xff]  ;;  %p1028_p0 = pneg %p1027_p12 }
  0x38   : > { %v883_v36 = vld [vmem:[%s1414_s3 + $0x48] sm:$0xff]  ;;  %v991_v39 = vld [vmem:[%s1412_s1 + $0x10] sm:$0xff]   ;;  %v890_v40 = vld [vmem:[%s1414_s3 + $0x80] sm:$0xff]  ;;  %p1034_p5 = por %p1033_p3, %p1032_p1 }
  0x39   : > { %360 = vperm.xlu0 %987, %v296_v26   ;;  %350 = vperm.xlu1 %988, %v294_v28   ;;  %v891_v41 = vld [vmem:[%s1414_s3 + $0x88] sm:$0xff]  ;;  %v886_v42 = vld [vmem:[%s1414_s3 + $0x60] sm:$0xff]  ;;  %v892_v43 = vld [vmem:[%s1414_s3 + $0x90] sm:$0xff] }
  0x3a   : > { %409 = vmatpush1.bf16.msra.mxu0 %v283_v20  ;;  %v992_v44 = vld [vmem:[%s1412_s1 + $0x18] sm:$0xff]   ;;  %v887_v45 = vld [vmem:[%s1414_s3 + $0x68] sm:$0xff]  ;;  %v888_v47 = vld [vmem:[%s1414_s3 + $0x70] sm:$0xff]  ;;  %p1035_p6 = pnand %p1034_p5, %p1028_p0 }
  0x3b   : > { %410 = vmatprep.subr.bf16.mxu0 %v282_v21  ;;  %v893_v46 = vld [vmem:[%s1414_s3 + $0x98] sm:$0xff]  ;;  %v894_v48 = vld [vmem:[%s1414_s3 + $0xa0] sm:$0xff]  ;;  %v895_v50 = vld [vmem:[%s1414_s3 + $0xa8] sm:$0xff] }
  0x3c   : > { %v889_v49 = vld [vmem:[%s1414_s3 + $0x78] sm:$0xff]  ;;  %v896_v51 = vld [vmem:[%s1414_s3 + $0xb0] sm:$0xff] }
  0x3d   : > { %335 = vperm.xlu0 %987, %v291_v30   ;;  %340 = vperm.xlu1 %988, %v292_v31   ;;  %v897_v52 = vld [vmem:[%s1414_s3 + $0xb8] sm:$0xff] }
  0x3e   : > { %411 = vmatpush1.bf16.msra.mxu0 %v281_v27 }
  0x41   : > { %902 = vmatmul.mubr.msk.bf16.vlgmr.msra.gmra.mxu0 %vm383_vm0, %v989_v29  ;;  %325 = vperm.xlu0 %987, %v289_v32  }
  0x42   : > { %438 = vmatprep.mubr.bf16.mxu0 %v1110_v0  ;;  %330 = vperm.xlu1 %988, %v290_v33  }
  0x45   : > { %503 = vperm.xlu0 %987, %v882_v35  }
  0x46   : > { %508 = vperm.xlu1 %988, %v883_v36  }
  0x49   : > { %903 = vmatmul.mubr.msk.bf16.gmra.mxu0 %vm383_vm0, %v990_v34  ;;  %513 = vperm.xlu0 %987, %v884_v37  }
  0x4a   : > { %448 = vmatprep.mubr.bf16.mxu0 %v1110_v0  ;;  %518 = vperm.xlu1 %988, %v885_v38  }
  0x4d   : > { %664 = vperm.xlu0 %987, %v890_v40  }
  0x4e   : > { %669 = vperm.xlu1 %988, %v891_v41  }
  0x51   : > { %904 = vmatmul.mubr.msk.bf16.gmra.mxu0 %vm383_vm0, %v991_v39  ;;  %523 = vperm.xlu0 %987, %v886_v42  }
  0x52   : > { %458 = vmatprep.mubr.bf16.mxu0 %v1110_v0  ;;  %674 = vperm.xlu1 %988, %v892_v43  }
  0x55   : > { %528 = vperm.xlu0 %987, %v887_v45  }
  0x56   : > { %679 = vperm.xlu1 %988, %v893_v46  }
  0x59   : > { %905 = vmatmul.mubr.msk.bf16.gmra.mxu0 %vm383_vm0, %v992_v44  ;;  %533 = vperm.xlu0 %987, %v888_v47  }
  0x5a   : > { %684 = vperm.xlu1 %988, %v894_v48  }
  0x5d   : > { %538 = vperm.xlu0 %987, %v889_v49  }
  0x5e   : > { %689 = vperm.xlu1 %988, %v895_v50  }
  0x61   : > { %694 = vperm.xlu0 %987, %v896_v51  }
  0x62   : > { %699 = vperm.xlu1 %988, %v897_v52  }
  0xb0   : > { %v346_v62 = vpop.permute.xlu1 %345  ;;  %v356_v1 = vpop.permute.xlu0 %355 }
  0xb4   : > { %v351_v4 = vpop.permute.xlu1 %350  ;;  %v361_v6 = vpop.permute.xlu0 %360 }
  0xb8   : > { %v341_v12 = vpop.permute.xlu1 %340  ;;  %v336_v17 = vpop.permute.xlu0 %335 }
  0xbc   : > { %v326_v36 = vpop.permute.xlu0 %325 }
  0xbd   : > { %v331_v29 = vpop.permute.xlu1 %330 }
 0x101   : > { %v430_v53 = vpop.f32.mrf.mxu0 }
 0x102   : > { %v431_v46 = vadd.f32 %v430_v53, %v326_v36  ;;  %v994_v53 = vld [vmem:[%s1413_s2 + $0x8] sm:$0xff]  }
 0x103   : > { %v432_v54 = vpop.f32.mrf.mxu0 }
 0x104   : > { %v433_v39 = vadd.f32 %v432_v54, %v326_v36  ;;  %v469_v52 = vmax.f32 %v431_v46, 0.0  ;;  %v993_v54 = vld [vmem:[%s1413_s2] sm:$0xff]  }
 0x105   : > { %v434_v55 = vpop.f32.mrf.mxu0 }
 0x106   : > { %v435_v41 = vadd.f32 %v434_v55, %v331_v29  ;;  %v470_v48 = vmax.f32 %v433_v39, 0.0  ;;  %v995_v55 = vld [vmem:[%s1413_s2 + $0x10] sm:$0xff]  }
 0x107   : > { %v436_v56 = vpop.f32.mrf.mxu0 }
 0x108   : > { %v437_v33 = vadd.f32 %v436_v56, %v331_v29  ;;  %v471_v49 = vmax.f32 %v435_v41, 0.0 }
 0x109   : > { %v440_v57 = vpop.f32.mrf.mxu0 }
 0x10a   : > { %v441_v37 = vadd.f32 %v440_v57, %v336_v17  ;;  %v472_v44 = vmax.f32 %v437_v33, 0.0  ;;  %v493_v56 = vpack.c.bf16 %v471_v49, %v469_v52  ;;  %v996_v57 = vld [vmem:[%s1413_s2 + $0x18] sm:$0xff]  }
 0x10b   : > { %v442_v58 = vpop.f32.mrf.mxu0 }
 0x10c   : > { %v443_v26 = vadd.f32 %v442_v58, %v336_v17  ;;  %v473_v47 = vmax.f32 %v441_v37, 0.0  ;;  %v494_v51 = vpack.c.bf16 %v472_v44, %v470_v48  ;;  %v504_v58 = vpop.permute.xlu0 %503 }
 0x10d   : > { %v444_v59 = vpop.f32.mrf.mxu0 }
 0x10e   : > { %v445_v30 = vadd.f32 %v444_v59, %v341_v12  ;;  %v474_v40 = vmax.f32 %v443_v26, 0.0  ;;  %v509_v59 = vpop.permute.xlu1 %508 }
 0x10f   : > { %v446_v60 = vpop.f32.mrf.mxu0 }
 0x110   : > { %v447_v20 = vadd.f32 %v446_v60, %v341_v12  ;;  %v475_v42 = vmax.f32 %v445_v30, 0.0  ;;  %v514_v60 = vpop.permute.xlu0 %513 }
 0x111   : > { %v450_v61 = vpop.f32.mrf.mxu0 }
 0x112   : > { %v451_v24 = vadd.f32 %v450_v61, %v346_v62  ;;  %v476_v34 = vmax.f32 %v447_v20, 0.0  ;;  %v495_v50 = vpack.c.bf16 %v475_v42, %v473_v47  ;;  %v519_v61 = vpop.permute.xlu1 %518 }
 0x113   : > { %v452_v63 = vpop.f32.mrf.mxu0 }
 0x114   : > { %v453_v15 = vadd.f32 %v452_v63, %v346_v62  ;;  %v477_v38 = vmax.f32 %v451_v24, 0.0  ;;  %v496_v45 = vpack.c.bf16 %v476_v34, %v474_v40  ;;  %v665_v62 = vpop.permute.xlu0 %664 }
 0x115   : > { %v454_v2 = vpop.f32.mrf.mxu0 }
 0x116   : > { %v455_v18 = vadd.f32 %v454_v2, %v351_v4  ;;  %v478_v27 = vmax.f32 %v453_v15, 0.0 }
 0x117   : > { %v456_v3 = vpop.f32.mrf.mxu0 }
 0x118   : > { %v457_v9 = vadd.f32 %v456_v3, %v351_v4  ;;  %v479_v31 = vmax.f32 %v455_v18, 0.0  ;;  %v524_v3 = vpop.permute.xlu0 %523 }
 0x119   : > { %v460_v5 = vpop.f32.mrf.mxu0 }
 0x11a   : > { %v461_v13 = vadd.f32 %v460_v5, %v356_v1  ;;  %v480_v21 = vmax.f32 %v457_v9, 0.0  ;;  %v497_v43 = vpack.c.bf16 %v479_v31, %v477_v38 }
 0x11b   : > { %v462_v7 = vpop.f32.mrf.mxu0 }
 0x11c   : > { %v463_v10 = vadd.f32 %v462_v7, %v356_v1  ;;  %v481_v25 = vmax.f32 %v461_v13, 0.0  ;;  %v498_v35 = vpack.c.bf16 %v480_v21, %v478_v27  ;;  %v670_v1 = vpop.permute.xlu1 %669 }
 0x11d   : > { %v464_v8 = vpop.f32.mrf.mxu0 }
 0x11e   : > { %v465_v11 = vadd.f32 %v464_v8, %v361_v6  ;;  %v482_v22 = vmax.f32 %v463_v10, 0.0 }
 0x11f   : > { %v466_v14 = vpop.f32.mrf.mxu0 }
 0x120   : > { %v467_v16 = vadd.f32 %v466_v14, %v361_v6  ;;  %v483_v19 = vmax.f32 %v465_v11, 0.0  ;;  %v675_v6 = vpop.permute.xlu1 %674 }
 0x122   : > { %v484_v23 = vmax.f32 %v467_v16, 0.0  ;;  %v499_v32 = vpack.c.bf16 %v483_v19, %v481_v25 }
 0x124   : > { %v500_v28 = vpack.c.bf16 %v484_v23, %v482_v22  ;;  %v680_v15 = vpop.permute.xlu1 %679 }
 0x126   : > { %581 = vmatprep.subr.bf16.mxu1 %v500_v28 }
 0x127   : > { %582 = vmatpush1.bf16.msra.mxu1 %v499_v32 }
 0x128   : > { %583 = vmatprep.subr.bf16.mxu1 %v498_v35  ;;  %v685_v34 = vpop.permute.xlu1 %684 }
 0x12b   : > { %584 = vmatpush1.bf16.msra.mxu1 %v497_v43 }
 0x12c   : > { %585 = vmatprep.subr.bf16.mxu1 %v496_v45 }
 0x12f   : > { %586 = vmatpush1.bf16.msra.mxu1 %v495_v50 }
 0x130   : > { %587 = vmatprep.subr.bf16.mxu1 %v494_v51 }
 0x133   : > { %588 = vmatpush1.bf16.msra.mxu1 %v493_v56 }
 0x136   : > { %910 = vmatmul.mubr.msk.bf16.vlgmr.msra.gmra.mxu1 %vm383_vm0, %v993_v54 }
 0x137   : > { %615 = vmatprep.mubr.bf16.mxu1 %v1110_v0 }
 0x13e   : > { %911 = vmatmul.mubr.msk.bf16.gmra.mxu1 %vm383_vm0, %v994_v53 }
 0x13f   : > { %625 = vmatprep.mubr.bf16.mxu1 %v1110_v0 }
 0x146   : > { %912 = vmatmul.mubr.msk.bf16.gmra.mxu1 %vm383_vm0, %v995_v55 }
 0x147   : > { %635 = vmatprep.mubr.bf16.mxu1 %v1110_v0  ;;  %v529_v0 = vpop.permute.xlu0 %528 }
 0x14b   : > { %v534_v21 = vpop.permute.xlu0 %533 }
 0x14e   : > { %913 = vmatmul.mubr.msk.bf16.gmra.mxu1 %vm383_vm0, %v996_v57  ;;  %v690_v57 = vpop.permute.xlu1 %689 }
 0x14f   : > { %v539_v42 = vpop.permute.xlu0 %538 }
 0x1f6   : > { %v607_v63 = vpop.f32.mrf.mxu1 }
 0x1f7   : > { %v608_v10 = vadd.f32 %v607_v63, %v504_v58 }
 0x1f8   : > { %v609_v2 = vpop.f32.mrf.mxu1 }
 0x1f9   : > { %v610_v14 = vadd.f32 %v609_v2, %v504_v58  ;;  %v646_v20 = vmax.f32 %v608_v10, 0.0  ;;  %v695_v2 = vpop.permute.xlu0 %694 }
 0x1fa   : > { %v611_v4 = vpop.f32.mrf.mxu1 }
 0x1fb   : > { %v612_v8 = vadd.f32 %v611_v4, %v509_v59  ;;  %v647_v26 = vmax.f32 %v610_v14, 0.0  ;;  %v702_v32 = vmul.f32 %v665_v62, %v646_v20 }
 0x1fc   : > { %v613_v5 = vpop.f32.mrf.mxu1 }
 0x1fd   : > { %v614_v11 = vadd.f32 %v613_v5, %v509_v59  ;;  %v648_v16 = vmax.f32 %v612_v8, 0.0  ;;  %v703_v40 = vmul.f32 %v665_v62, %v647_v26 }
 0x1fe   : > { %v617_v7 = vpop.f32.mrf.mxu1 }
 0x1ff   : > { %v618_v12 = vadd.f32 %v617_v7, %v514_v60  ;;  %v649_v22 = vmax.f32 %v614_v11, 0.0  ;;  %v704_v28 = vmul.f32 %v670_v1, %v648_v16 }
 0x200   : > { %v619_v9 = vpop.f32.mrf.mxu1 }
 0x201   : > { %v620_v17 = vadd.f32 %v619_v9, %v514_v60  ;;  %v650_v23 = vmax.f32 %v618_v12, 0.0  ;;  %v705_v35 = vmul.f32 %v670_v1, %v649_v22  ;;  %v718_v43 = vadd.f32 %v704_v28, %v702_v32 }
 0x202   : > { %v621_v13 = vpop.f32.mrf.mxu1 }
 0x203   : > { %v622_v18 = vadd.f32 %v621_v13, %v519_v61  ;;  %v651_v29 = vmax.f32 %v620_v17, 0.0  ;;  %v706_v36 = vmul.f32 %v675_v6, %v650_v23  ;;  %v731_v50 = vadd.f32 %v705_v35, %v703_v40 }
 0x204   : > { %v623_v19 = vpop.f32.mrf.mxu1  ;;  %v745_v40 = vstv %s744_s18 }
 0x205   : > { %v624_v24 = vadd.f32 %v623_v19, %v519_v61  ;;  %v652_v30 = vmax.f32 %v622_v18, 0.0  ;;  %v707_v44 = vmul.f32 %v675_v6, %v651_v29  ;;  %v719_v51 = vadd.f32 %v718_v43, %v706_v36 }
 0x206   : > { %v627_v25 = vpop.f32.mrf.mxu1 }
 0x207   : > { %v628_v27 = vadd.f32 %v627_v25, %v524_v3  ;;  %v653_v37 = vmax.f32 %v624_v24, 0.0  ;;  %v708_v45 = vmul.f32 %v680_v15, %v652_v30  ;;  %v732_v58 = vadd.f32 %v731_v50, %v707_v44 }
 0x208   : > { %v629_v31 = vpop.f32.mrf.mxu1 }
 0x209   : > { %v630_v33 = vadd.f32 %v629_v31, %v524_v3  ;;  %v654_v38 = vmax.f32 %v628_v27, 0.0  ;;  %v709_v52 = vmul.f32 %v680_v15, %v653_v37  ;;  %v720_v59 = vadd.f32 %v719_v51, %v708_v45  ;;  %v700_v15 = vpop.permute.xlu1 %699 }
 0x20a   : > { %v631_v39 = vpop.f32.mrf.mxu1  ;;  %v1111_v31 = vmov 1966171168  }
 0x20b   : > { %v632_v41 = vadd.f32 %v631_v39, %v529_v0  ;;  %v655_v46 = vmax.f32 %v630_v33, 0.0  ;;  %v710_v56 = vmul.f32 %v685_v34, %v654_v38  ;;  %v733_v3 = vadd.f32 %v732_v58, %v709_v52 }
 0x20c   : > { %v633_v47 = vpop.f32.mrf.mxu1  ;;  %v752_v32 = vunpack.c.l.s4 %v1111_v31  ;;  %v754_v33 = vlaneseq }
 0x20d   : > { %v656_v48 = vmax.f32 %v632_v41, 0.0  ;;  %v634_v49 = vadd.f32 %v633_v47, %v529_v0  ;;  %v711_v60 = vmul.f32 %v685_v34, %v655_v46  ;;  %v721_v4 = vadd.f32 %v720_v59, %v710_v56 }
 0x20e   : > { %v637_v54 = vpop.f32.mrf.mxu1  ;;  %v753_v38 = vunpack.c.0.s8 %v752_v32  ;;  %v755_v39 = vshrl.u32 %v754_v33, 7  ;;  %vm768_vm1 = vcmp.lt.s32.totalorder %v754_v33, 256 }
 0x20f   : > { %v657_v53 = vmax.f32 %v634_v49, 0.0  ;;  %v638_v55 = vadd.f32 %v637_v54, %v534_v21  ;;  %v712_v62 = vmul.f32 %v690_v57, %v656_v48  ;;  %v734_v9 = vadd.f32 %v733_v3, %v711_v60 }
 0x210   : > { %v639_v61 = vpop.f32.mrf.mxu1  ;;  %v756_v44 = vsub.s32 %v753_v38, %v755_v39 }
 0x211   : > { %v658_v63 = vmax.f32 %v638_v55, 0.0  ;;  %v640_v1 = vadd.f32 %v639_v61, %v534_v21  ;;  %v713_v6 = vmul.f32 %v690_v57, %v657_v53  ;;  %v722_v11 = vadd.f32 %v721_v4, %v712_v62 }
 0x212   : > { %v641_v5 = vpop.f32.mrf.mxu1 }
 0x213   : > { %v714_v7 = vmul.f32 %v695_v2, %v658_v63  ;;  %v659_v0 = vmax.f32 %v640_v1, 0.0  ;;  %v642_v8 = vadd.f32 %v641_v5, %v539_v42  ;;  %v735_v16 = vadd.f32 %v734_v9, %v713_v6 }
 0x214   : > { %v643_v10 = vpop.f32.mrf.mxu1 }
 0x215   : > { %v715_v12 = vmul.f32 %v695_v2, %v659_v0  ;;  %v660_v13 = vmax.f32 %v642_v8, 0.0  ;;  %v644_v14 = vadd.f32 %v643_v10, %v539_v42  ;;  %v723_v17 = vadd.f32 %v722_v11, %v714_v7 }
 0x217   : > { %v716_v18 = vmul.f32 %v700_v15, %v660_v13  ;;  %v661_v19 = vmax.f32 %v644_v14, 0.0  ;;  %v736_v20 = vadd.f32 %v735_v16, %v715_v12 }
 0x219   : > { %v724_v21 = vadd.f32 %v723_v17, %v716_v18  ;;  %v717_v22 = vmul.f32 %v700_v15, %v661_v19 }
 0x21b   : > { %v725_v23 = vrot.slane %v724_v21, 4  ;;  %v737_v24 = vadd.f32 %v736_v20, %v717_v22 }
 0x21d   : > { %v726_v25 = vadd.f32 %v725_v23, %v724_v21  ;;  %v738_v26 = vrot.slane %v737_v24, 4 }
 0x21f   : > { %v727_v27 = vrot.slane %v726_v25, 2  ;;  %v739_v28 = vadd.f32 %v738_v26, %v737_v24 }
 0x221   : > { %v728_v29 = vadd.f32 %v727_v27, %v726_v25  ;;  %v740_v30 = vrot.slane %v739_v28, 2 }
 0x223   : > { %v729_v34 = vrot.slane %v728_v29, 1  ;;  %v741_v35 = vadd.f32 %v740_v30, %v739_v28 }
 0x225   : > { %v730_v36 = vadd.f32 %v729_v34, %v728_v29  ;;  %v742_v37 = vrot.slane %v741_v35, 1 }
 0x227   : > { %v743_v41 = vadd.f32 %v742_v37, %v741_v35  ;;  %v746_v42 = vadd.f32 %v745_v40, %v730_v36 }
 0x229   : > { %v747_v43 = vadd.f32 %v745_v40, %v743_v41 }
 0x22b   : > { %v750_v45 = vcombine.low %v746_v42, %v747_v43 }
 0x22d   : > { %v757_v46 = vrot.slane %v750_v45, %v756_v44 }
 0x22f   : > { %v764_v47 = vrot.slane %v757_v46, %v756_v44 }
 0x231   : > { %770 = vst.msk [vmem:[%s261_s26] sm:$0x3] %vm768_vm1, %v764_v47 }
 0x232   : > { %1038 = shalt.err (!%p1035_p6)
}
 0x233   : > { %s1039_s15 = scalar_lea.hbm %s786_s10, 32  ;;  %s1043_s17 = scalar_lea.hbm %s1416_s5, 64 }
 0x234   : > { %p1040_p7 = scmp.ne.s32.totalorder %s786_s10, %s1039_s15  ;;  %p1044_p13 = scmp.lt.s32.totalorder %s786_s10, %s1416_s5 }
 0x235   : > { %p1045_p2 = scmp.lt.s32.totalorder %s1043_s17, %s1039_s15 }
 0x236   : > { %p1041_p10 = pnand %p1040_p7, %p1197_p9 }
 0x237   : > { %p1046_p8 = por %p1045_p2, %p1044_p13 }
 0x238   : > { %p1042_p4 = pneg %p1041_p10 }
 0x23a   : > { %p1047_p12 = pnand %p1046_p8, %p1042_p4 }
 0x23c   : > { %1050 = shalt.err (!%p1047_p12)
}
 0x23d   : > { %923 = dma.vmem_to_hbm [thread:$0]  (%p1197_p9), %s789_s28, 32, %s786_s10, %s772_s12  }
 0x23e PF: > { %s800_s4 = sand.u32 1, %s1085_s20   ;;  %p1422_p0 = scmp.ge.s32.totalorder %s1105_s25, 2 }
 0x23f   : > { %s801_s26 = scalar_lea.sflag [#allocation5], %s800_s4 }
 0x240   : > { %p930_p1 = pnand %p1422_p0, %p1204_p11 }
 0x242   : > { %p931_p3 = pneg %p930_p1 }
 0x244   : > { %1080 = dma.done.wait (%p931_p3), %s801_s26, 32  }
 0x245   : > { %1082 = vsyncadd (%p931_p3), %s801_s26, 4294967264  ;;  %s22_s25 = sadd.s32 1, %s1105_s25   ;;  %s1423_s20 = smov %s1089_s21 }
 0x246   : > { %p19_p5 = scmp.ge.s32.totalorder %s22_s25, 4   ;;  %s1424_s21 = smov %s1093_s22 }
 0x247   : > { %s1425_s22 = smov %s1202_s8  ;;  %s1426_s23 = smov %s1101_s24 }
 0x248   : > { %s1427_s24 = smov %s1429_s27  ;;  %21 = sbr.rel (!%p19_p5) target bundleno = 8 (0x8), region = 87 }
 0x24d   :  { %806 = vsyncpa [#allocation4], 1 }
 0x24e   :  { %808 = vsyncpa [#allocation4 + $0x1], 1 }
 0x24f   :  { %809 = vsyncpa [#allocation5], 1 }
 0x250   :  { %811 = vsyncpa [#allocation5 + $0x1], 1 }

</bundles_post_ra>
